<compile_context>
chip_gen: v6e
topology: v6e:2x2x1
jax: 0.10.0
libtpu: 0.0.40
codegen_flags: <defaults>
</compile_context>

<pallas_src>
import jax
import jax.numpy as jnp
from jax import lax
from jax.experimental import pallas as pl
from jax.experimental.pallas import tpu as pltpu

HID = 32   # FCLoc hidden width (fixed by the module)
OUT = 2    # ScaleFCLoc outdim = 2 * 1


def scale_fc_loc_kernel(x_ref, w1_ref, b1_ref, w2_ref, b2_ref, theta_ref):
    # (tb, indim) @ (indim, 32) + (1, 32), bias + ReLU fused in one vreg pass.
    h = jnp.maximum(
        jnp.dot(x_ref[...], w1_ref[...], preferred_element_type=jnp.float32)
        + b1_ref[...], 0.0)
    # (tb, 32) @ (32, 2) + (1, 2) -> theta_scale = [sx, sy]
    ts = (jnp.dot(h, w2_ref[...], preferred_element_type=jnp.float32)
          + b2_ref[...])
    # Scatter [sx, sy] into the flattened 2x3 affine rows [sx, 0, 0, 0, sy, 0]
    # with a tiny constant (2, 6) selection matrix S[i, 4*i] = 1 (no lane
    # slicing / cross-lane broadcast needed).
    ri = lax.broadcasted_iota(jnp.int32, (OUT, 6), 0)
    ci = lax.broadcasted_iota(jnp.int32, (OUT, 6), 1)
    scatter = (ci == 4 * ri).astype(jnp.float32)
    theta_ref[...] = jnp.dot(ts, scatter, preferred_element_type=jnp.float32)


def scale_fc_loc(x, w1, b1, w2, b2, *, tile_b=None):
    b, indim = x.shape
    if tile_b is None:
        tile_b = min(b, 256)
    assert b % tile_b == 0 and tile_b % 8 == 0, "keep batch tiles 8-aligned"
    nb = b // tile_b

    theta_flat = pl.pallas_call(
        scale_fc_loc_kernel,
        out_shape=jax.ShapeDtypeStruct((b, 2 * 3), jnp.float32),
        grid=(nb,),
        in_specs=[
            pl.BlockSpec((tile_b, indim), lambda i: (i, 0)),   # x tile
            pl.BlockSpec((indim, HID), lambda i: (0, 0)),      # w1 (resident)
            pl.BlockSpec((1, HID), lambda i: (0, 0)),          # b1
            pl.BlockSpec((HID, OUT), lambda i: (0, 0)),        # w2
            pl.BlockSpec((1, OUT), lambda i: (0, 0)),          # b2
        ],
        out_specs=pl.BlockSpec((tile_b, 2 * 3), lambda i: (i, 0)),
        compiler_params=pltpu.CompilerParams(
            dimension_semantics=("parallel",)),
    )(x, w1, b1, w2, b2)

    # Row-major (b, 6) -> (b, 2, 3): row 0 = [sx, 0, 0], row 1 = [0, sy, 0].
    return theta_flat.reshape(b, 2, 3)
    # TODO(synk): the PyTorch module also stashes theta_scale[-1] on the host
    # via set_parameter(); that Python-side side effect is not reproduced.


def reference(x, w1, b1, w2, b2):
    h = jnp.maximum(x @ w1 + b1, 0.0)
    ts = h @ w2 + b2
    theta = jnp.zeros((x.shape[0], 2, 3), jnp.float32)
    theta = theta.at[:, 0, 0].set(ts[:, 0])
    theta = theta.at[:, 1, 1].set(ts[:, 1])
    return theta


if __name__ == "__main__":
    b, indim = 8, 64
    key = jax.random.PRNGKey(0)
    ks = jax.random.split(key, 5)

    x = jax.random.normal(ks[0], (b, indim), dtype=jnp.float32)
    # Linear weights pre-transposed to (in_features, out_features).
    w1 = 0.1 * jax.random.normal(ks[1], (indim, HID), dtype=jnp.float32)
    b1 = 0.1 * jax.random.normal(ks[2], (1, HID), dtype=jnp.float32)

    fn = jax.jit(scale_fc_loc)

    # 1) Parameters exactly as ScaleFCLoc.__init__ sets them:
    #    fc_loc[2].weight = 0, fc_loc[2].bias = [1, 1]  (identity scaling).
    w2_init = jnp.zeros((HID, OUT), dtype=jnp.float32)
    b2_init = jnp.array([[1.0, 1.0]], dtype=jnp.float32)
    theta = fn(x, w1, b1, w2_init, b2_init)
    jax.block_until_ready(theta)
    assert theta.shape == (b, 2, 3)
    assert jnp.allclose(theta, reference(x, w1, b1, w2_init, b2_init),
                        atol=1e-5, rtol=1e-5)

    # 2) Random final-layer parameters to exercise the full data path.
    w2 = 0.1 * jax.random.normal(ks[3], (HID, OUT), dtype=jnp.float32)
    b2 = 0.1 * jax.random.normal(ks[4], (1, OUT), dtype=jnp.float32)
    theta2 = fn(x, w1, b1, w2, b2)
    jax.block_until_ready(theta2)
    assert jnp.allclose(theta2, reference(x, w1, b1, w2, b2),
                        atol=1e-5, rtol=1e-5)

    print("KERNEL_OK")
</pallas_src>

<mosaic_0001>
module attributes {stable_mosaic.version = 11 : i64} {
  func.func @scale_fc_loc_kernel(%arg0: i32, %arg1: memref<8x64xf32, #tpu.memory_space<vmem>>, %arg2: memref<64x32xf32, #tpu.memory_space<vmem>>, %arg3: memref<1x32xf32, #tpu.memory_space<vmem>>, %arg4: memref<32x2xf32, #tpu.memory_space<vmem>>, %arg5: memref<1x2xf32, #tpu.memory_space<vmem>>, %arg6: memref<8x6xf32, #tpu.memory_space<vmem>>) attributes {dimension_semantics = [#tpu.dimension_semantics<parallel>], iteration_bounds = array<i64: 1>, scalar_prefetch = 0 : i64, scratch_operands = 0 : i64, tpu.core_type = #tpu.core_type<tc>, window_params = [{transform_indices = @transform_0, window_bounds = array<i64: 8, 64>}, {pipeline_mode = #tpu.pipeline_mode<synchronous>, transform_indices = @transform_1, window_bounds = array<i64: 64, 32>}, {pipeline_mode = #tpu.pipeline_mode<synchronous>, transform_indices = @transform_2, window_bounds = array<i64: 1, 32>}, {pipeline_mode = #tpu.pipeline_mode<synchronous>, transform_indices = @transform_3, window_bounds = array<i64: 32, 2>}, {pipeline_mode = #tpu.pipeline_mode<synchronous>, transform_indices = @transform_4, window_bounds = array<i64: 1, 2>}, {transform_indices = @transform_5, window_bounds = array<i64: 8, 6>}]} {
    %c0 = arith.constant 0 : index
    %c0_0 = arith.constant 0 : index
    %0 = vector.load %arg1[%c0, %c0_0] : memref<8x64xf32, #tpu.memory_space<vmem>>, vector<8x64xf32>
    %c0_1 = arith.constant 0 : index
    %c0_2 = arith.constant 0 : index
    %1 = vector.load %arg2[%c0_1, %c0_2] : memref<64x32xf32, #tpu.memory_space<vmem>>, vector<64x32xf32>
    %cst = arith.constant dense<0.000000e+00> : vector<8x32xf32>
    %2 = tpu.matmul %0, %1, %cst {dimension_numbers = #tpu.dot_dimension_numbers<[1], [0], [0], [1], [0, 0, 1, 1], [], []>} : vector<8x64xf32>, vector<64x32xf32>, vector<8x32xf32> -> vector<8x32xf32>
    %c0_3 = arith.constant 0 : index
    %c0_4 = arith.constant 0 : index
    %3 = vector.load %arg3[%c0_3, %c0_4] : memref<1x32xf32, #tpu.memory_space<vmem>>, vector<1x32xf32>
    %4 = vector.broadcast %3 : vector<1x32xf32> to vector<8x32xf32>
    %5 = arith.addf %2, %4 : vector<8x32xf32>
    %cst_5 = arith.constant 0.000000e+00 : f32
    %6 = vector.broadcast %cst_5 : f32 to vector<8x32xf32>
    %7 = arith.maximumf %5, %6 : vector<8x32xf32>
    %c0_6 = arith.constant 0 : index
    %c0_7 = arith.constant 0 : index
    %8 = vector.load %arg4[%c0_6, %c0_7] : memref<32x2xf32, #tpu.memory_space<vmem>>, vector<32x2xf32>
    %cst_8 = arith.constant dense<0.000000e+00> : vector<8x2xf32>
    %9 = tpu.matmul %7, %8, %cst_8 {dimension_numbers = #tpu.dot_dimension_numbers<[1], [0], [0], [1], [0, 0, 1, 1], [], []>} : vector<8x32xf32>, vector<32x2xf32>, vector<8x2xf32> -> vector<8x2xf32>
    %c0_9 = arith.constant 0 : index
    %c0_10 = arith.constant 0 : index
    %10 = vector.load %arg5[%c0_9, %c0_10] : memref<1x2xf32, #tpu.memory_space<vmem>>, vector<1x2xf32>
    %11 = vector.broadcast %10 : vector<1x2xf32> to vector<8x2xf32>
    %12 = arith.addf %9, %11 : vector<8x2xf32>
    %13 = tpu.iota {dimensions = array<i32: 0>} : vector<2x6xi32>
    %14 = tpu.iota {dimensions = array<i32: 1>} : vector<2x6xi32>
    %c4_i32 = arith.constant 4 : i32
    %15 = vector.broadcast %c4_i32 : i32 to vector<2x6xi32>
    %16 = arith.muli %15, %13 : vector<2x6xi32>
    %17 = arith.cmpi eq, %14, %16 : vector<2x6xi32>
    %18 = arith.extui %17 : vector<2x6xi1> to vector<2x6xi32>
    %19 = arith.sitofp %18 : vector<2x6xi32> to vector<2x6xf32>
    %cst_11 = arith.constant dense<0.000000e+00> : vector<8x6xf32>
    %20 = tpu.matmul %12, %19, %cst_11 {dimension_numbers = #tpu.dot_dimension_numbers<[1], [0], [0], [1], [0, 0, 1, 1], [], []>} : vector<8x2xf32>, vector<2x6xf32>, vector<8x6xf32> -> vector<8x6xf32>
    %c0_12 = arith.constant 0 : index
    %c0_13 = arith.constant 0 : index
    %21 = vector.load %arg6[%c0_12, %c0_13] : memref<8x6xf32, #tpu.memory_space<vmem>>, vector<8x6xf32>
    tpu.vector_store %arg6[%c0_12, %c0_13], %20 {strides = array<i32>} : memref<8x6xf32, #tpu.memory_space<vmem>>, vector<8x6xf32>,
    return
  }
  func.func @transform_0(%arg0: i32) -> (i32, i32) {
    %c0_i32 = arith.constant 0 : i32
    %c0_i32_0 = arith.constant 0 : i32
    return %arg0, %c0_i32 : i32, i32
  }
  func.func @transform_1(%arg0: i32) -> (i32, i32) {
    %c0_i32 = arith.constant 0 : i32
    %c0_i32_0 = arith.constant 0 : i32
    %c0_i32_1 = arith.constant 0 : i32
    return %c0_i32, %c0_i32_0 : i32, i32
  }
  func.func @transform_2(%arg0: i32) -> (i32, i32) {
    %c0_i32 = arith.constant 0 : i32
    %c0_i32_0 = arith.constant 0 : i32
    %c0_i32_1 = arith.constant 0 : i32
    return %c0_i32, %c0_i32_0 : i32, i32
  }
  func.func @transform_3(%arg0: i32) -> (i32, i32) {
    %c0_i32 = arith.constant 0 : i32
    %c0_i32_0 = arith.constant 0 : i32
    %c0_i32_1 = arith.constant 0 : i32
    return %c0_i32, %c0_i32_0 : i32, i32
  }
  func.func @transform_4(%arg0: i32) -> (i32, i32) {
    %c0_i32 = arith.constant 0 : i32
    %c0_i32_0 = arith.constant 0 : i32
    %c0_i32_1 = arith.constant 0 : i32
    return %c0_i32, %c0_i32_0 : i32, i32
  }
  func.func @transform_5(%arg0: i32) -> (i32, i32) {
    %c0_i32 = arith.constant 0 : i32
    %c0_i32_0 = arith.constant 0 : i32
    return %arg0, %c0_i32 : i32, i32
  }
}

</mosaic_0001>

<bundles_post_ra>
// kernel: scale_fc_loc.1
= control target key start
LH: loop header
LB: loop body
LE: loop exit
PB: predicated region body
PF: predicated region fallthrough
CT: control target
= control target key end

     0   :  { %v348_v0 = vmov 0.0   ;;  %vm349_vm0 = vmmov 0   ;;  %vm36_vm1 = vcmask 523264   ;;  %v196_v14 = vlaneseq  ;;  %s431_s1 = inlined_call_operand.vmem [shape: f32[64,32], index: 1, kind: input, shape index: {}]   ;;  %s432_s3 = inlined_call_operand.vmem [shape: f32[32,2], index: 3, kind: input, shape index: {}]   ;;  %s433_s0 = inlined_call_operand.vmem [shape: f32[8,64], index: 0, kind: input, shape index: {}]   ;;  %s434_s2 = inlined_call_operand.vmem [shape: f32[1,32], index: 2, kind: input, shape index: {}]   ;;  %s435_s4 = inlined_call_operand.vmem [shape: f32[1,2], index: 4, kind: input, shape index: {}]   ;;  %s436_s5 = inlined_call_operand.vmem [shape: f32[8,6], index: 5, kind: output, shape index: {}]  }
   0x1   :  { %311 = vmatprep.subr.mxu0 %v348_v0  ;;  %v28_v1 = vld [vmem:[%s431_s1 + $0x38] sm:$0xff]  ;;  %v27_v2 = vld [vmem:[%s431_s1 + $0x30] sm:$0xff]  ;;  %327 = vmatprep.mubr.msk.f32.mxu0 %vm349_vm0, %v348_v0  ;;  %v26_v3 = vld [vmem:[%s431_s1 + $0x28] sm:$0xff]  ;;  %vm122_vm3 = vcmask 261120   ;;  %vm208_vm4 = vcmask 1041408   ;;  %vm204_vm5 = vcmask 15360  }
   0x2   :  { %312 = vmatpush3.msra.mxu0 %v28_v1  ;;  %330 = vmatprep.subr.mxu1 %v348_v0  ;;  %v114_v4 = vld [vmem:[%s432_s3 + $0x18] sm:$0xff]  ;;  %v25_v5 = vld [vmem:[%s431_s1 + $0x20] sm:$0xff]  ;;  %v23_v7 = vld [vmem:[%s431_s1 + $0x10] sm:$0xff]  ;;  %v197_v15 = vshrl.u32 %v196_v14, 7  ;;  %v199_v16 = vand.u32 127, %v196_v14  ;;  %vm282_vm6 = vcmask 48128  }
   0x3   :  { %313 = vmatprep.subr.mxu0 %v348_v0  ;;  %338 = vmatprep.mubr.msk.f32.mxu1 %vm349_vm0, %v348_v0  ;;  %v24_v6 = vld [vmem:[%s431_s1 + $0x18] sm:$0xff]  ;;  %v22_v8 = vld [vmem:[%s431_s1 + $0x8] sm:$0xff]  ;;  %v21_v9 = vld [vmem:[%s431_s1] sm:$0xff] }
   0x4   :  { %314 = vmatpush3.msra.mxu0 %v27_v2  ;;  %331 = vmatpush3.msra.mxu1 %v114_v4  ;;  %v20_v10 = vld [vmem:[%s433_s0] sm:$0xff]  ;;  %v113_v11 = vld [vmem:[%s432_s3 + $0x10] sm:$0xff]  ;;  %v112_v12 = vld [vmem:[%s432_s3 + $0x8] sm:$0xff]  ;;  %v200_v17 = vmul.u32 4, %v197_v15 }
   0x5   :  { %315 = vmatprep.subr.mxu0 %v348_v0  ;;  %332 = vmatprep.subr.mxu1 %v348_v0  ;;  %v111_v13 = vld [vmem:[%s432_s3] sm:$0xff] }
   0x6   :  { %316 = vmatpush3.msra.mxu0 %v26_v3  ;;  %333 = vmatpush3.msra.mxu1 %v113_v11  ;;  %v288_v18 = vld [vmem:[%s434_s2] ss:$0 sm:$0xff]  ;;  %vm201_vm2 = vcmp.eq.s32.totalorder %v199_v16, %v200_v17 }
   0x7   :  { %317 = vmatprep.subr.mxu0 %v348_v0  ;;  %334 = vmatprep.subr.mxu1 %v348_v0  ;;  %v292_v23 = vsel %vm201_vm2, 1.0, %v348_v0  ;;  %v290_v24 = vld [vmem:[%s435_s4] ss:$0 sm:$0xff] }
   0x8   :  { %318 = vmatpush3.msra.mxu0 %v25_v5  ;;  %335 = vmatpush3.msra.mxu1 %v112_v12 }
   0x9   :  { %319 = vmatprep.subr.mxu0 %v348_v0  ;;  %336 = vmatprep.subr.mxu1 %v348_v0 }
   0xa   :  { %320 = vmatpush3.msra.mxu0 %v24_v6  ;;  %337 = vmatpush3.msra.mxu1 %v111_v13 }
   0xb   :  { %321 = vmatprep.subr.mxu0 %v348_v0  ;;  %341 = vmatprep.subr.mxu1 %v348_v0 }
   0xc   :  { %322 = vmatpush3.msra.mxu0 %v23_v7 }
   0xd   :  { %323 = vmatprep.subr.mxu0 %v348_v0 }
   0xe   :  { %324 = vmatpush3.msra.mxu0 %v22_v8 }
   0xf   :  { %325 = vmatprep.subr.mxu0 %v348_v0 }
  0x10   :  { %326 = vmatpush3.msra.mxu0 %v21_v9 }
  0x11   :  { %328 = vmatmul.mubr.msk.f32.vlgmr.msra.gmra.mxu0 %vm36_vm1, %v20_v10 }
  0xd1   :  { %v106_v19 = vpop.f32.mrf.mxu0 }
  0xd2   :  { %v107_v20 = vadd.f32 %v288_v18, %v106_v19 }
  0xd3   :  { %v329_v21 = vpop.f32.mrf.mxu0 }
  0xd4   :  { %v110_v22 = vmax.f32 %v107_v20, 0.0 }
  0xd6   :  { %339 = vmatmul.mubr.msk.f32.vlgmr.msra.gmra.mxu1 %vm122_vm3, %v110_v22 }
  0xd7   :  { %342 = vmatpush3.msk.msra.mxu1 %vm208_vm4, %v292_v23  ;;  %343 = vmatprep.mubr.msk.f32.mxu1 %vm349_vm0, %v348_v0 }
 0x196   :  { %v192_v25 = vpop.f32.mrf.mxu1 }
 0x197   :  { %v193_v26 = vadd.f32 %v290_v24, %v192_v25 }
 0x198   :  { %v340_v27 = vpop.f32.mrf.mxu1 }
 0x199   :  { %344 = vmatmul.mubr.msk.f32.vlgmr.msra.gmra.mxu1 %vm204_vm5, %v193_v26 }
 0x259   :  { %v278_v28 = vpop.f32.mrf.mxu1 }
 0x25a   :  { %283 = vst.msk [vmem:[%s436_s5] sm:$0xff] %vm282_vm6, %v278_v28 }
 0x25b   :  { %v345_v29 = vpop.f32.mrf.mxu1 }

</bundles_post_ra>
